<compile_context>
chip_gen: v7x
topology: tpu7x:2x2x1
jax: 0.10.0
libtpu: 0.0.40
codegen_flags: <defaults>
</compile_context>

<pallas_src>
import functools

import jax
import jax.numpy as jnp
from jax.experimental import pallas as pl
from jax.experimental.pallas import tpu as pltpu

# ----------------------------- model config -----------------------------
EMB_DIMS = [(10, 8), (12, 8), (20, 16)]        # (cardinality, emb_dim)
NO_OF_EMBS = sum(d for _, d in EMB_DIMS)       # 32
NO_OF_CONT = 4
IN_FEATURES = NO_OF_EMBS + NO_OF_CONT          # 36
H1 = 208
H2 = 208
OUT = 104
H_PAD = 256                                    # MXU-dense hidden width
OUT_PAD = 128                                  # lane-dense output width
BN_EPS = 1e-5
NEG_INF = -1e30
DEFAULT_TB = 512                               # batch tile (rows / grid step)


def _round_up(x, m):
    return ((x + m - 1) // m) * m


# ------------------------------ Pallas kernel ---------------------------
def _fused_mlp_kernel(x_ref,
                      w1_ref, b1_ref,
                      w2_ref, b2_ref,
                      w3_ref, b3_ref,
                      o_ref):
    """fc1(+bn_cont+bn1) + relu + fc2(+bn2) + relu + fc3 + softmax, all in VMEM."""
    x = x_ref[...]                                                 # [TB, 36] bf16

    # fc1 (bn_cont and bn1 pre-folded into w1/b1)
    h = jnp.dot(x, w1_ref[...], preferred_element_type=jnp.float32) + b1_ref[...]
    h = jnp.maximum(h, 0.0)                                        # [TB, 256] f32

    # fc2 (bn2 pre-folded)
    h = jnp.dot(h.astype(jnp.bfloat16), w2_ref[...],
                preferred_element_type=jnp.float32) + b2_ref[...]
    h = jnp.maximum(h, 0.0)                                        # [TB, 256] f32

    # fc3 + softmax over features; padded logit lanes carry bias -1e30 -> exp == 0
    logits = jnp.dot(h.astype(jnp.bfloat16), w3_ref[...],
                     preferred_element_type=jnp.float32) + b3_ref[...]
    m = jnp.max(logits, axis=-1, keepdims=True)
    e = jnp.exp(logits - m)
    denom = jnp.sum(e, axis=-1, keepdims=True)
    o_ref[...] = (e * pl.reciprocal(denom, approx=True)).astype(o_ref.dtype)


@functools.partial(jax.jit, static_argnames=("tb",))
def fused_mlp(x, w1, b1, w2, b2, w3, b3, *, tb):
    b_pad = x.shape[0]                         # already a multiple of tb
    grid = (b_pad // tb,)

    def resident(shape):
        # weights/biases stay VMEM-resident across all batch tiles
        return pl.BlockSpec(shape, lambda i: (0, 0))

    return pl.pallas_call(
        _fused_mlp_kernel,
        out_shape=jax.ShapeDtypeStruct((b_pad, OUT_PAD), jnp.float32),
        grid=grid,
        in_specs=[
            pl.BlockSpec((tb, IN_FEATURES), lambda i: (i, 0)),     # x (pipelined)
            resident(w1.shape), resident(b1.shape),
            resident(w2.shape), resident(b2.shape),
            resident(w3.shape), resident(b3.shape),
        ],
        out_specs=pl.BlockSpec((tb, OUT_PAD), lambda i: (i, 0)),
        compiler_params=pltpu.CompilerParams(
            dimension_semantics=("parallel",),         # megacore sharding on v7x
            vmem_limit_bytes=32 * 1024 * 1024,         # fits v5e/v6e/v7x budgets
        ),
    )(x, w1, b1, w2, b2, w3, b3)


# ------------------------------ parameters ------------------------------
def init_params(key):
    keys = jax.random.split(key, 12)
    p = {}
    p["emb"] = [
        jax.random.normal(keys[i], (card, dim), jnp.float32) * 0.1
        for i, (card, dim) in enumerate(EMB_DIMS)
    ]
    k = len(EMB_DIMS)

    def linear(kw, kb, fan_in, fan_out):
        bound = 1.0 / jnp.sqrt(fan_in)
        w = jax.random.uniform(kw, (fan_in, fan_out), jnp.float32, -bound, bound)
        b = jax.random.uniform(kb, (fan_out,), jnp.float32, -bound, bound)
        return w, b

    def bn_fold(kmu, feat, var_val):
        gamma = jnp.ones((feat,), jnp.float32)
        beta = jnp.zeros((feat,), jnp.float32)
        mean = jax.random.normal(kmu, (feat,), jnp.float32) * 0.05
        var = jnp.ones((feat,), jnp.float32) * var_val
        scale = gamma / jnp.sqrt(var + BN_EPS)
        shift = beta - mean * scale
        return scale, shift

    # raw (PyTorch-equivalent) parameters, BN already in eval scale/shift form
    bnc_s, bnc_t = bn_fold(keys[k + 0], NO_OF_CONT, 1.1)
    w1, b1 = linear(keys[k + 1], keys[k + 2], IN_FEATURES, H1)
    s1, t1 = bn_fold(keys[k + 3], H1, 0.9)
    w2, b2 = linear(keys[k + 4], keys[k + 5], H1, H2)
    s2, t2 = bn_fold(keys[k + 6], H2, 0.9)
    w3, b3 = linear(keys[k + 7], keys[k + 8], H2, OUT)

    # keep raw params for the pure-JAX reference
    p["ref"] = dict(bnc_s=bnc_s, bnc_t=bnc_t, w1=w1, b1=b1, s1=s1, t1=t1,
                    w2=w2, b2=b2, s2=s2, t2=t2, w3=w3, b3=b3)

    # ---- one-time constant folding for the kernel ----
    # bn_cont folded into fc1: (xc*s + t) @ Wc = xc @ (diag(s) Wc) + t @ Wc
    w1f = w1.at[NO_OF_EMBS:, :].multiply(bnc_s[:, None])
    b1f = b1 + bnc_t @ w1[NO_OF_EMBS:, :]
    # bn1 folded into fc1, bn2 folded into fc2
    w1f = w1f * s1[None, :]
    b1f = b1f * s1 + t1
    w2f = w2 * s2[None, :]
    b2f = b2 * s2 + t2

    # ---- pad to MXU/lane-dense shapes (zeros; padded logits get -inf bias) ----
    w1p = jnp.zeros((IN_FEATURES, H_PAD), jnp.float32).at[:, :H1].set(w1f)
    b1p = jnp.zeros((1, H_PAD), jnp.float32).at[:, :H1].set(b1f)
    w2p = jnp.zeros((H_PAD, H_PAD), jnp.float32).at[:H1, :H2].set(w2f)
    b2p = jnp.zeros((1, H_PAD), jnp.float32).at[:, :H2].set(b2f)
    w3p = jnp.zeros((H_PAD, OUT_PAD), jnp.float32).at[:H2, :OUT].set(w3)
    b3p = jnp.full((1, OUT_PAD), NEG_INF, jnp.float32).at[:, :OUT].set(b3)

    # bf16 MXU operands, f32 biases / epilogue
    p["w1"] = w1p.astype(jnp.bfloat16)
    p["w2"] = w2p.astype(jnp.bfloat16)
    p["w3"] = w3p.astype(jnp.bfloat16)
    p["b1"], p["b2"], p["b3"] = b1p, b2p, b3p
    return p


# ------------------------------ forward ---------------------------------
def forward(params, x_cat, x_cont, *, tb=DEFAULT_TB):
    # embedding lookups + concat (glue); emb_dropout/dropout1/dropout2 = identity
    # in eval mode; bn_cont is folded into fc1, so raw x_cont is concatenated.
    embs = [params["emb"][i][x_cat[:, i]] for i in range(len(EMB_DIMS))]
    x = jnp.concatenate(embs + [x_cont.astype(jnp.float32)], axis=1)   # [B, 36]

    B = x.shape[0]
    tb = min(tb, _round_up(B, 8))
    b_pad = _round_up(B, tb)
    x = jnp.pad(x, ((0, b_pad - B), (0, 0))).astype(jnp.bfloat16)

    out = fused_mlp(x,
                    params["w1"], params["b1"],
                    params["w2"], params["b2"],
                    params["w3"], params["b3"], tb=tb)
    return out[:B, :OUT]


# ------------------------------ reference -------------------------------
def forward_ref(params, x_cat, x_cont):
    r = params["ref"]
    embs = [params["emb"][i][x_cat[:, i]] for i in range(len(EMB_DIMS))]
    x = jnp.concatenate(embs, axis=1)
    xc = x_cont * r["bnc_s"] + r["bnc_t"]
    x = jnp.concatenate([x, xc], axis=1)
    h = jnp.maximum((x @ r["w1"] + r["b1"]) * r["s1"] + r["t1"], 0.0)
    h = jnp.maximum((h @ r["w2"] + r["b2"]) * r["s2"] + r["t2"], 0.0)
    logits = h @ r["w3"] + r["b3"]
    return jax.nn.softmax(logits, axis=-1)


# ------------------------------ main ------------------------------------
if __name__ == "__main__":
    key = jax.random.PRNGKey(0)
    k_par, k_cat, k_cont = jax.random.split(key, 3)
    params = init_params(k_par)

    B = 8
    cards = jnp.array([c for c, _ in EMB_DIMS], jnp.int32)
    x_cat = (jax.random.randint(k_cat, (B, len(EMB_DIMS)), 0, 1_000_000) % cards).astype(jnp.int32)
    x_cont = jax.random.normal(k_cont, (B, NO_OF_CONT), jnp.float32)

    out = jax.block_until_ready(forward(params, x_cat, x_cont))
    ref = forward_ref(params, x_cat, x_cont)

    assert out.shape == (B, OUT)
    # bf16 MXU operands + approx reciprocal -> compare against f32 ref at loose tol
    assert jnp.allclose(jnp.sum(out, axis=-1), 1.0, atol=5e-3), "softmax rows must sum to ~1"
    assert jnp.allclose(out, ref, atol=1e-2, rtol=2e-2), "mismatch vs f32 JAX reference"

    print("KERNEL_OK")
</pallas_src>

<mosaic_0001>
module attributes {stable_mosaic.version = 11 : i64} {
  func.func @_fused_mlp_kernel(%arg0: i32, %arg1: memref<8x36xbf16, #tpu.memory_space<vmem>>, %arg2: memref<36x256xbf16, #tpu.memory_space<vmem>>, %arg3: memref<1x256xf32, #tpu.memory_space<vmem>>, %arg4: memref<256x256xbf16, #tpu.memory_space<vmem>>, %arg5: memref<1x256xf32, #tpu.memory_space<vmem>>, %arg6: memref<256x128xbf16, #tpu.memory_space<vmem>>, %arg7: memref<1x128xf32, #tpu.memory_space<vmem>>, %arg8: memref<8x128xf32, #tpu.memory_space<vmem>>) attributes {dimension_semantics = [#tpu.dimension_semantics<parallel>], iteration_bounds = array<i64: 1>, scalar_prefetch = 0 : i64, scratch_operands = 0 : i64, tpu.core_type = #tpu.core_type<tc>, window_params = [{transform_indices = @transform_0, window_bounds = array<i64: 8, 36>}, {pipeline_mode = #tpu.pipeline_mode<synchronous>, transform_indices = @transform_1, window_bounds = array<i64: 36, 256>}, {pipeline_mode = #tpu.pipeline_mode<synchronous>, transform_indices = @transform_2, window_bounds = array<i64: 1, 256>}, {pipeline_mode = #tpu.pipeline_mode<synchronous>, transform_indices = @transform_3, window_bounds = array<i64: 256, 256>}, {pipeline_mode = #tpu.pipeline_mode<synchronous>, transform_indices = @transform_4, window_bounds = array<i64: 1, 256>}, {pipeline_mode = #tpu.pipeline_mode<synchronous>, transform_indices = @transform_5, window_bounds = array<i64: 256, 128>}, {pipeline_mode = #tpu.pipeline_mode<synchronous>, transform_indices = @transform_6, window_bounds = array<i64: 1, 128>}, {transform_indices = @transform_7, window_bounds = array<i64: 8, 128>}]} {
    %c0 = arith.constant 0 : index
    %c0_0 = arith.constant 0 : index
    %0 = vector.load %arg1[%c0, %c0_0] : memref<8x36xbf16, #tpu.memory_space<vmem>>, vector<8x36xbf16>
    %c0_1 = arith.constant 0 : index
    %c0_2 = arith.constant 0 : index
    %1 = vector.load %arg2[%c0_1, %c0_2] : memref<36x256xbf16, #tpu.memory_space<vmem>>, vector<36x256xbf16>
    %cst = arith.constant dense<0.000000e+00> : vector<8x256xf32>
    %2 = tpu.matmul %0, %1, %cst {dimension_numbers = #tpu.dot_dimension_numbers<[1], [0], [0], [1], [0, 0, 1, 1], [], []>} : vector<8x36xbf16>, vector<36x256xbf16>, vector<8x256xf32> -> vector<8x256xf32>
    %c0_3 = arith.constant 0 : index
    %c0_4 = arith.constant 0 : index
    %3 = vector.load %arg3[%c0_3, %c0_4] : memref<1x256xf32, #tpu.memory_space<vmem>>, vector<1x256xf32>
    %4 = vector.broadcast %3 : vector<1x256xf32> to vector<8x256xf32>
    %5 = arith.addf %2, %4 : vector<8x256xf32>
    %cst_5 = arith.constant 0.000000e+00 : f32
    %6 = vector.broadcast %cst_5 : f32 to vector<8x256xf32>
    %7 = arith.maximumf %5, %6 : vector<8x256xf32>
    %8 = arith.truncf %7 : vector<8x256xf32> to vector<8x256xbf16>
    %c0_6 = arith.constant 0 : index
    %c0_7 = arith.constant 0 : index
    %9 = vector.load %arg4[%c0_6, %c0_7] : memref<256x256xbf16, #tpu.memory_space<vmem>>, vector<256x256xbf16>
    %cst_8 = arith.constant dense<0.000000e+00> : vector<8x256xf32>
    %10 = tpu.matmul %8, %9, %cst_8 {dimension_numbers = #tpu.dot_dimension_numbers<[1], [0], [0], [1], [0, 0, 1, 1], [], []>} : vector<8x256xbf16>, vector<256x256xbf16>, vector<8x256xf32> -> vector<8x256xf32>
    %c0_9 = arith.constant 0 : index
    %c0_10 = arith.constant 0 : index
    %11 = vector.load %arg5[%c0_9, %c0_10] : memref<1x256xf32, #tpu.memory_space<vmem>>, vector<1x256xf32>
    %12 = vector.broadcast %11 : vector<1x256xf32> to vector<8x256xf32>
    %13 = arith.addf %10, %12 : vector<8x256xf32>
    %cst_11 = arith.constant 0.000000e+00 : f32
    %14 = vector.broadcast %cst_11 : f32 to vector<8x256xf32>
    %15 = arith.maximumf %13, %14 : vector<8x256xf32>
    %16 = arith.truncf %15 : vector<8x256xf32> to vector<8x256xbf16>
    %c0_12 = arith.constant 0 : index
    %c0_13 = arith.constant 0 : index
    %17 = vector.load %arg6[%c0_12, %c0_13] : memref<256x128xbf16, #tpu.memory_space<vmem>>, vector<256x128xbf16>
    %cst_14 = arith.constant dense<0.000000e+00> : vector<8x128xf32>
    %18 = tpu.matmul %16, %17, %cst_14 {dimension_numbers = #tpu.dot_dimension_numbers<[1], [0], [0], [1], [0, 0, 1, 1], [], []>} : vector<8x256xbf16>, vector<256x128xbf16>, vector<8x128xf32> -> vector<8x128xf32>
    %c0_15 = arith.constant 0 : index
    %c0_16 = arith.constant 0 : index
    %19 = vector.load %arg7[%c0_15, %c0_16] : memref<1x128xf32, #tpu.memory_space<vmem>>, vector<1x128xf32>
    %20 = vector.broadcast %19 : vector<1x128xf32> to vector<8x128xf32>
    %21 = arith.addf %18, %20 : vector<8x128xf32>
    %cst_17 = arith.constant dense<0xFF800000> : vector<8xf32>
    %22 = vector.multi_reduction <maximumf>, %21, %cst_17 [1] : vector<8x128xf32> to vector<8xf32>
    %23 = vector.shape_cast %22 : vector<8xf32> to vector<8x1xf32>
    %24 = vector.broadcast %23 : vector<8x1xf32> to vector<8x128xf32>
    %25 = arith.subf %21, %24 : vector<8x128xf32>
    %26 = math.exp %25 : vector<8x128xf32>
    %cst_18 = arith.constant dense<0.000000e+00> : vector<8xf32>
    %27 = vector.multi_reduction <add>, %26, %cst_18 [1] : vector<8x128xf32> to vector<8xf32>
    %28 = vector.shape_cast %27 : vector<8xf32> to vector<8x1xf32>
    %29 = tpu.reciprocal %28 {approx = true} : vector<8x1xf32> -> vector<8x1xf32>
    %30 = vector.broadcast %29 : vector<8x1xf32> to vector<8x128xf32>
    %31 = arith.mulf %26, %30 : vector<8x128xf32>
    %c0_19 = arith.constant 0 : index
    %c0_20 = arith.constant 0 : index
    %32 = vector.load %arg8[%c0_19, %c0_20] : memref<8x128xf32, #tpu.memory_space<vmem>>, vector<8x128xf32>
    tpu.vector_store %arg8[%c0_19, %c0_20], %31 {strides = array<i32>} : memref<8x128xf32, #tpu.memory_space<vmem>>, vector<8x128xf32>,
    return
  }
  func.func @transform_0(%arg0: i32) -> (i32, i32) {
    %c0_i32 = arith.constant 0 : i32
    %c0_i32_0 = arith.constant 0 : i32
    return %arg0, %c0_i32 : i32, i32
  }
  func.func @transform_1(%arg0: i32) -> (i32, i32) {
    %c0_i32 = arith.constant 0 : i32
    %c0_i32_0 = arith.constant 0 : i32
    %c0_i32_1 = arith.constant 0 : i32
    return %c0_i32, %c0_i32_0 : i32, i32
  }
  func.func @transform_2(%arg0: i32) -> (i32, i32) {
    %c0_i32 = arith.constant 0 : i32
    %c0_i32_0 = arith.constant 0 : i32
    %c0_i32_1 = arith.constant 0 : i32
    return %c0_i32, %c0_i32_0 : i32, i32
  }
  func.func @transform_3(%arg0: i32) -> (i32, i32) {
    %c0_i32 = arith.constant 0 : i32
    %c0_i32_0 = arith.constant 0 : i32
    %c0_i32_1 = arith.constant 0 : i32
    return %c0_i32, %c0_i32_0 : i32, i32
  }
  func.func @transform_4(%arg0: i32) -> (i32, i32) {
    %c0_i32 = arith.constant 0 : i32
    %c0_i32_0 = arith.constant 0 : i32
    %c0_i32_1 = arith.constant 0 : i32
    return %c0_i32, %c0_i32_0 : i32, i32
  }
  func.func @transform_5(%arg0: i32) -> (i32, i32) {
    %c0_i32 = arith.constant 0 : i32
    %c0_i32_0 = arith.constant 0 : i32
    %c0_i32_1 = arith.constant 0 : i32
    return %c0_i32, %c0_i32_0 : i32, i32
  }
  func.func @transform_6(%arg0: i32) -> (i32, i32) {
    %c0_i32 = arith.constant 0 : i32
    %c0_i32_0 = arith.constant 0 : i32
    %c0_i32_1 = arith.constant 0 : i32
    return %c0_i32, %c0_i32_0 : i32, i32
  }
  func.func @transform_7(%arg0: i32) -> (i32, i32) {
    %c0_i32 = arith.constant 0 : i32
    %c0_i32_0 = arith.constant 0 : i32
    return %arg0, %c0_i32 : i32, i32
  }
}

</mosaic_0001>

<bundles_post_ra>
// kernel: fused_mlp.1
= control target key start
LH: loop header
LB: loop body
LE: loop exit
PB: predicated region body
PF: predicated region fallthrough
CT: control target
= control target key end

     0   :  { %12 = vsyncpa [#allocation3], 0  ;;  %s1039_s0 = inlined_call_operand.hbm [shape: bf16[8,36], index: 0, kind: input, shape index: {}]   ;;  %s1040_s1 = inlined_call_operand.hbm [shape: bf16[36,256], index: 1, kind: input, shape index: {}]   ;;  %s1041_s2 = inlined_call_operand.vmem [shape: f32[1,256], index: 2, kind: input, shape index: {}]   ;;  %s1042_s3 = inlined_call_operand.hbm [shape: bf16[256,256], index: 3, kind: input, shape index: {}]   ;;  %s1043_s4 = inlined_call_operand.vmem [shape: f32[1,256], index: 4, kind: input, shape index: {}]   ;;  %s1044_s5 = inlined_call_operand.hbm [shape: bf16[256,128], index: 5, kind: input, shape index: {}]   ;;  %s1045_s6 = inlined_call_operand.vmem [shape: f32[1,128], index: 6, kind: input, shape index: {}]   ;;  %s1046_s7 = inlined_call_operand.hbm [shape: f32[8,128], index: 7, kind: output, shape index: {}]  }
   0x1   :  { %13 = vsyncpa [#allocation6], 0 }
   0x2   :  { %14 = vsyncpa [#allocation9], 0 }
   0x3   :  { %15 = vsyncpa [#allocation4], 0  ;;  %s914_s24 = smov [#allocation5]   ;;  %s796_s28 = scalar_lea.hbm %s1040_s1, 640 }
   0x4   :  { %s31_s25 = sshll.u32 %s914_s24, 4  ;;  %p797_p0 = scmp.ne.s32.totalorder %s1040_s1, %s796_s28  ;;  %s32_s25 = int_to_ptr.vmem [resolvable:$true] %s31_s25 }
   0x5   :  { %p800_p1 = scmp.lt.u32.totalorder %s796_s28, %s1040_s1 }
   0x7   :  { %p802_p2 = pnand %p800_p1, %p797_p0 }
   0x9   :  { %805 = shalt.err (!%p802_p2)
}
   0xa   :  { %s806_s10 = scalar_lea.vmem %s32_s25, 640  ;;  %p811_p4 = scmp.lt.s32.totalorder %s32_s25, %s32_s25 }
   0xb   :  { %p807_p3 = scmp.ne.s32.totalorder %s32_s25, %s806_s10  ;;  %p812_p5 = scmp.lt.s32.totalorder %s806_s10, %s806_s10 }
   0xd   :  { %p813_p6 = por %p812_p5, %p811_p4 }
   0xf   :  { %p814_p7 = pnand %p813_p6, %p807_p3 }
  0x11   :  { %817 = shalt.err (!%p814_p7)
}
  0x12   :  { %s915_s11 = smov 128   ;;  %s916_s12 = smov 8  }
  0x13   :  { %37 = dma.hbm_to_vmem [thread:$0]  %s1040_s1, 640, %s32_s25, [#allocation6], %s915_s11, %s915_s11, %s916_s12  }
  0x14   :  { %s917_s15 = smov [#allocation2]   ;;  %s918_s17 = smov [#allocation7]  }
  0x15   :  { %s22_s16 = sshll.u32 %s917_s15, 4  ;;  %s45_s18 = sshll.u32 %s918_s17, 4  ;;  %s23_s16 = int_to_ptr.vmem [resolvable:$true] %s22_s16  ;;  %s46_s18 = int_to_ptr.vmem [resolvable:$true] %s45_s18 }
  0x16   :  { %s818_s21 = scalar_lea.hbm %s1039_s0, 64 }
  0x17   :  { %p819_p8 = scmp.ne.s32.totalorder %s1039_s0, %s818_s21  ;;  %p822_p9 = scmp.lt.u32.totalorder %s818_s21, %s1039_s0 }
  0x19   :  { %p824_p10 = pnand %p822_p9, %p819_p8 }
  0x1b   :  { %827 = shalt.err (!%p824_p10)
}
  0x1c   :  { %s828_s1 = scalar_lea.vmem %s23_s16, 64  ;;  %p833_p12 = scmp.lt.s32.totalorder %s23_s16, %s23_s16 }
  0x1d   :  { %p829_p11 = scmp.ne.s32.totalorder %s23_s16, %s828_s1  ;;  %p834_p13 = scmp.lt.s32.totalorder %s828_s1, %s828_s1 }
  0x1f   :  { %p835_p0 = por %p834_p13, %p833_p12 }
  0x21   :  { %p836_p1 = pnand %p835_p0, %p829_p11 }
  0x23   :  { %839 = shalt.err (!%p836_p1)
}
  0x24   :  { %25 = dma.hbm_to_vmem [thread:$0]  %s1039_s0, 64, %s23_s16, [#allocation3]  }
  0x25   :  { %s840_s30 = scalar_lea.hbm %s1042_s3, 4096 }
  0x26   :  { %p841_p2 = scmp.ne.s32.totalorder %s1042_s3, %s840_s30  ;;  %p844_p3 = scmp.lt.u32.totalorder %s840_s30, %s1042_s3 }
  0x28   :  { %p846_p4 = pnand %p844_p3, %p841_p2 }
  0x2a   :  { %849 = shalt.err (!%p846_p4)
}
  0x2b   :  { %s850_s14 = scalar_lea.vmem %s46_s18, 4096  ;;  %p855_p6 = scmp.lt.s32.totalorder %s46_s18, %s46_s18 }
  0x2c   :  { %p851_p5 = scmp.ne.s32.totalorder %s46_s18, %s850_s14  ;;  %p856_p7 = scmp.lt.s32.totalorder %s850_s14, %s850_s14 }
  0x2e   :  { %p857_p8 = por %p856_p7, %p855_p6 }
  0x30   :  { %p858_p9 = pnand %p857_p8, %p851_p5 }
  0x32   :  { %861 = shalt.err (!%p858_p9)
}
  0x33   :  { %51 = dma.hbm_to_vmem [thread:$0]  %s1042_s3, 4096, %s46_s18, [#allocation6], %s915_s11, %s915_s11, %s916_s12  }
  0x34   :  { %s919_s16 = smov [#allocation8]   ;;  %s862_s21 = scalar_lea.hbm %s1044_s5, 2048 }
  0x35   :  { %s59_s17 = sshll.u32 %s919_s16, 4  ;;  %p863_p10 = scmp.ne.s32.totalorder %s1044_s5, %s862_s21  ;;  %s60_s17 = int_to_ptr.vmem [resolvable:$true] %s59_s17 }
  0x36   :  { %p866_p11 = scmp.lt.u32.totalorder %s862_s21, %s1044_s5 }
  0x38   :  { %p868_p12 = pnand %p866_p11, %p863_p10 }
  0x3a   :  { %871 = shalt.err (!%p868_p12)
}
  0x3b   :  { %s872_s1 = scalar_lea.vmem %s60_s17, 2048  ;;  %p877_p0 = scmp.lt.s32.totalorder %s60_s17, %s60_s17 }
  0x3c   :  { %p873_p13 = scmp.ne.s32.totalorder %s60_s17, %s872_s1  ;;  %p878_p1 = scmp.lt.s32.totalorder %s872_s1, %s872_s1 }
  0x3e   :  { %p879_p2 = por %p878_p1, %p877_p0 }
  0x40   :  { %p880_p3 = pnand %p879_p2, %p873_p13 }
  0x42   :  { %883 = shalt.err (!%p880_p3)
}
  0x43   :  { %s920_s3 = smov 64   ;;  %s921_s11 = smov 4  }
  0x44   :  { %65 = dma.hbm_to_vmem [thread:$0]  %s1044_s5, 2048, %s60_s17, [#allocation9], %s920_s3, %s920_s3, %s921_s11  }
  0x45   :  { %906 = dma.done.wait [#allocation3], 64  }
  0x46   :  { %907 = vsyncadd [#allocation3], 4294967232 }
  0x47   :  { %908 = dma.done.wait [#allocation6], 4736  }
  0x48   :  { %909 = vsyncadd [#allocation6], 4294962560 }
  0x49   :  { %910 = dma.done.wait [#allocation9], 2048  }
  0x4a   :  { %911 = vsyncadd [#allocation9], 4294965248  ;;  %v922_v0 = vmov 0   ;;  %v720_v1 = vld [vmem:[#allocation5 + $0x4] ss:$8 sps:$4 sm:$0xff]   ;;  %vm128_vm0 = vcmask 1041408   ;;  %v89_v54 = vlaneseq }
  0x4b   :  { %167 = vmatprep.mubr.bf16.mxu0 %v922_v0  ;;  %v722_v2 = vld [vmem:[#allocation5] ss:$8 sps:$4 sm:$0xff]   ;;  %135 = vmatprep.subr.bf16.mxu0 %v720_v1  ;;  %v723_v3 = vld [vmem:[#allocation5 + $0x14] ss:$8 sps:$4 sm:$0xff]   ;;  %v725_v5 = vld [vmem:[#allocation5 + $0x10] ss:$8 sps:$4 sm:$0xff]  }
  0x4c   :  { %v86_v4 = vld [vmem:[#allocation5 + $0x20] sm:$0x33]  ;;  %136 = vmatpush1.bf16.msra.mxu0 %v722_v2  ;;  %v728_v8 = vld [vmem:[#allocation7 + $0x4] ss:$8 sps:$4 sm:$0xff]   ;;  %v730_v9 = vld [vmem:[#allocation7] ss:$8 sps:$4 sm:$0xff]  }
  0x4d   :  { %137 = vmatprep.subr.bf16.mxu0 %v723_v3  ;;  %v636_v6 = vcombine.high %v86_v4, %v86_v4  ;;  %v635_v7 = vcombine.low %v86_v4, %v86_v4  ;;  %v731_v10 = vld [vmem:[#allocation7 + $0x14] ss:$8 sps:$4 sm:$0xff]   ;;  %384 = vmatprep.subr.bf16.mxu1 %v728_v8  ;;  %v733_v11 = vld [vmem:[#allocation7 + $0x10] ss:$8 sps:$4 sm:$0xff]   ;;  %v734_v13 = vld [vmem:[#allocation7 + $0x24] ss:$8 sps:$4 sm:$0xff]  }
  0x4e   :  { %385 = vmatpush1.bf16.msra.mxu1 %v730_v9  ;;  %v81_v14 = vld [vmem:[#allocation2] sm:$0xf]  ;;  %vm124_vm1 = vcmask 293888   ;;  %v736_v15 = vld [vmem:[#allocation7 + $0x20] ss:$8 sps:$4 sm:$0xff]   ;;  %v782_v48 = vld [vmem:[#allocation8 + $0x58] sm:$0xff]  }
  0x4f   :  { %v130_v12 = vsel %vm128_vm0, %v635_v7, 0  ;;  %386 = vmatprep.subr.bf16.mxu1 %v731_v10  ;;  %v737_v16 = vld [vmem:[#allocation7 + $0x34] ss:$8 sps:$4 sm:$0xff]   ;;  %v739_v17 = vld [vmem:[#allocation7 + $0x30] ss:$8 sps:$4 sm:$0xff]   ;;  %v776_v42 = vld [vmem:[#allocation8 + $0x40] sm:$0xff]  }
  0x50   :  { %138 = vmatpush1.bf16.msra.mxu0 %v725_v5  ;;  %v740_v18 = vld [vmem:[#allocation7 + $0x44] ss:$8 sps:$4 sm:$0xff]   ;;  %v742_v19 = vld [vmem:[#allocation7 + $0x40] ss:$8 sps:$4 sm:$0xff]   ;;  %v743_v20 = vld [vmem:[#allocation7 + $0x54] ss:$8 sps:$4 sm:$0xff]  }
  0x51   :  { %637 = vmatprep.subr.msk.bf16.mxu0 %vm128_vm0, %v636_v6  ;;  %v745_v21 = vld [vmem:[#allocation7 + $0x50] ss:$8 sps:$4 sm:$0xff]   ;;  %v746_v22 = vld [vmem:[#allocation7 + $0x64] ss:$8 sps:$4 sm:$0xff]   ;;  %v748_v23 = vld [vmem:[#allocation7 + $0x60] ss:$8 sps:$4 sm:$0xff]  }
  0x52   :  { %387 = vmatpush1.bf16.msra.mxu1 %v733_v11  ;;  %v749_v24 = vld [vmem:[#allocation7 + $0x74] ss:$8 sps:$4 sm:$0xff]   ;;  %v751_v25 = vld [vmem:[#allocation7 + $0x70] ss:$8 sps:$4 sm:$0xff]   ;;  %v752_v26 = vld [vmem:[#allocation7 + $0x84] ss:$8 sps:$4 sm:$0xff]  }
  0x53   :  { %388 = vmatprep.subr.bf16.mxu1 %v734_v13  ;;  %v754_v27 = vld [vmem:[#allocation7 + $0x80] ss:$8 sps:$4 sm:$0xff]   ;;  %v755_v28 = vld [vmem:[#allocation7 + $0x94] ss:$8 sps:$4 sm:$0xff]   ;;  %v757_v29 = vld [vmem:[#allocation7 + $0x90] ss:$8 sps:$4 sm:$0xff]  }
  0x54   :  { %140 = vmatpush1.bf16.msra.mxu0 %v130_v12  ;;  %v758_v30 = vld [vmem:[#allocation7 + $0xa4] ss:$8 sps:$4 sm:$0xff]   ;;  %v760_v31 = vld [vmem:[#allocation7 + $0xa0] ss:$8 sps:$4 sm:$0xff]   ;;  %v761_v32 = vld [vmem:[#allocation7 + $0xb4] ss:$8 sps:$4 sm:$0xff]  }
  0x55   :  { %v763_v33 = vld [vmem:[#allocation7 + $0xb0] ss:$8 sps:$4 sm:$0xff]   ;;  %v764_v34 = vld [vmem:[#allocation7 + $0xc4] ss:$8 sps:$4 sm:$0xff]   ;;  %v766_v35 = vld [vmem:[#allocation7 + $0xc0] ss:$8 sps:$4 sm:$0xff]   ;;  %688 = vmatprep.subr.bf16.mxu0 %v776_v42 }
  0x56   :  { %389 = vmatpush1.bf16.msra.mxu1 %v736_v15  ;;  %v767_v36 = vld [vmem:[#allocation7 + $0xd4] ss:$8 sps:$4 sm:$0xff]   ;;  %v769_v37 = vld [vmem:[#allocation7 + $0xd0] ss:$8 sps:$4 sm:$0xff]   ;;  %v770_v38 = vld [vmem:[#allocation7 + $0xe4] ss:$8 sps:$4 sm:$0xff]  }
  0x57   :  { %638 = vmatmul.mubr.msk.bf16.vlgmr.msra.gmra.mrb[0].mxu0 %vm124_vm1, %v81_v14  ;;  %390 = vmatprep.subr.bf16.mxu1 %v737_v16  ;;  %v772_v39 = vld [vmem:[#allocation7 + $0xe0] ss:$8 sps:$4 sm:$0xff]   ;;  %v773_v40 = vld [vmem:[#allocation7 + $0xf4] ss:$8 sps:$4 sm:$0xff]   ;;  %v775_v41 = vld [vmem:[#allocation7 + $0xf0] ss:$8 sps:$4 sm:$0xff]  }
  0x58   :  { %v777_v43 = vld [vmem:[#allocation8] sm:$0xff]   ;;  %v778_v44 = vld [vmem:[#allocation8 + $0x48] sm:$0xff]   ;;  %v780_v46 = vld [vmem:[#allocation8 + $0x50] sm:$0xff]   ;;  %v90_v55 = vshrl.u32 %v89_v54, 7 }
  0x59   :  { %689 = vmatpush3.bf16.msra.mxu0 %v777_v43  ;;  %v779_v45 = vld [vmem:[#allocation8 + $0x8] sm:$0xff]   ;;  %v781_v47 = vld [vmem:[#allocation8 + $0x10] sm:$0xff]   ;;  %v783_v49 = vld [vmem:[#allocation8 + $0x18] sm:$0xff]  }
  0x5a   :  { %391 = vmatpush1.bf16.msra.mxu1 %v739_v17  ;;  %690 = vmatprep.subr.bf16.mxu0 %v778_v44  ;;  %v784_v50 = vld [vmem:[#allocation8 + $0x60] sm:$0xff]   ;;  %v786_v52 = vld [vmem:[#allocation8 + $0x68] sm:$0xff]   ;;  %v91_v56 = vsub.s32 0, %v90_v55  ;;  %v87_v57 = vld [vmem:[%s1041_s2] sm:$0x3]  ;;  %v95_v58 = vsub.s32 1, %v90_v55 }
  0x5b   :  { %392 = vmatprep.subr.bf16.mxu1 %v740_v18  ;;  %v785_v51 = vld [vmem:[#allocation8 + $0x20] sm:$0xff]   ;;  %v787_v53 = vld [vmem:[#allocation8 + $0x28] sm:$0xff]   ;;  %v788_v7 = vld [vmem:[#allocation8 + $0x70] sm:$0xff]  }
  0x5c   :  { %v92_v59 = vrot.slane %v87_v57, %v91_v56  ;;  %v96_v60 = vrot.slane %v87_v57, %v95_v58  ;;  %v789_v8 = vld [vmem:[#allocation8 + $0x30] sm:$0xff]   ;;  %v790_v9 = vld [vmem:[#allocation8 + $0x78] sm:$0xff]  }
  0x5d   :  { %691 = vmatpush3.bf16.msra.mxu0 %v779_v45  ;;  %v791_v10 = vld [vmem:[#allocation8 + $0x38] sm:$0xff]   ;;  %v212_v11 = vld [vmem:[%s1043_s4] sm:$0x3]  ;;  %s923_s4 = smov [#allocation10]  }
  0x5e   :  { %393 = vmatpush1.bf16.msra.mxu1 %v742_v19  ;;  %692 = vmatprep.subr.bf16.mxu0 %v780_v46  ;;  %v217_v12 = vrot.slane %v212_v11, %v91_v56  ;;  %v221_v13 = vrot.slane %v212_v11, %v95_v58  ;;  %s620_s30 = sshll.u32 %s923_s4, 4  ;;  %s621_s30 = int_to_ptr.vmem [resolvable:$true] %s620_s30 }
  0x5f   :  { %394 = vmatprep.subr.bf16.mxu1 %v743_v20  ;;  %p889_p5 = scmp.lt.s32.totalorder %s621_s30, %s621_s30 }
  0x61   :  { %693 = vmatpush3.bf16.msra.mxu0 %v781_v47 }
  0x62   :  { %395 = vmatpush1.bf16.msra.mxu1 %v745_v21  ;;  %694 = vmatprep.subr.bf16.mxu0 %v782_v48 }
  0x63   :  { %396 = vmatprep.subr.bf16.mxu1 %v746_v22 }
  0x65   :  { %695 = vmatpush3.bf16.msra.mxu0 %v783_v49 }
  0x66   :  { %397 = vmatpush1.bf16.msra.mxu1 %v748_v23  ;;  %696 = vmatprep.subr.bf16.mxu0 %v784_v50 }
  0x67   :  { %398 = vmatprep.subr.bf16.mxu1 %v749_v24 }
  0x69   :  { %697 = vmatpush3.bf16.msra.mxu0 %v785_v51 }
  0x6a   :  { %399 = vmatpush1.bf16.msra.mxu1 %v751_v25  ;;  %698 = vmatprep.subr.bf16.mxu0 %v786_v52 }
  0x6b   :  { %400 = vmatprep.subr.bf16.mxu1 %v752_v26  ;;  %v671_v26 = vld [vmem:[%s1045_s6] ss:$0 sm:$0xff]  ;;  %s884_s6 = scalar_lea.vmem %s621_s30, 128 }
  0x6c   :  { %p885_p4 = scmp.ne.s32.totalorder %s621_s30, %s884_s6  ;;  %p890_p6 = scmp.lt.s32.totalorder %s884_s6, %s884_s6 }
  0x6d   :  { %699 = vmatpush3.bf16.msra.mxu0 %v787_v53 }
  0x6e   :  { %401 = vmatpush1.bf16.msra.mxu1 %v754_v27  ;;  %700 = vmatprep.subr.bf16.mxu0 %v788_v7  ;;  %p891_p7 = por %p890_p6, %p889_p5 }
  0x6f   :  { %402 = vmatprep.subr.bf16.mxu1 %v755_v28 }
  0x70   :  { %p892_p8 = pnand %p891_p7, %p885_p4 }
  0x71   :  { %701 = vmatpush3.bf16.msra.mxu0 %v789_v8 }
  0x72   :  { %403 = vmatpush1.bf16.msra.mxu1 %v757_v29  ;;  %702 = vmatprep.subr.bf16.mxu0 %v790_v9 }
  0x73   :  { %404 = vmatprep.subr.bf16.mxu1 %v758_v30 }
  0x75   :  { %703 = vmatpush3.bf16.msra.mxu0 %v791_v10 }
  0x76   :  { %405 = vmatpush1.bf16.msra.mxu1 %v760_v31 }
  0x77   :  { %406 = vmatprep.subr.bf16.mxu1 %v761_v32 }
  0x7a   :  { %407 = vmatpush1.bf16.msra.mxu1 %v763_v33 }
  0x7b   :  { %408 = vmatprep.subr.bf16.mxu1 %v764_v34 }
  0x7e   :  { %409 = vmatpush1.bf16.msra.mxu1 %v766_v35 }
  0x7f   :  { %410 = vmatprep.subr.bf16.mxu1 %v767_v36 }
  0x82   :  { %411 = vmatpush1.bf16.msra.mxu1 %v769_v37 }
  0x83   :  { %412 = vmatprep.subr.bf16.mxu1 %v770_v38 }
  0x86   :  { %413 = vmatpush1.bf16.msra.mxu1 %v772_v39 }
  0x87   :  { %414 = vmatprep.subr.bf16.mxu1 %v773_v40 }
  0x8a   :  { %415 = vmatpush1.bf16.msra.mxu1 %v775_v41 }
 0x12a   :  { %v169_v61 = vpop.f32.mrb[0].mxu0 }
 0x12b   :  { %v170_v62 = vadd.f32 %v169_v61, %v92_v59  ;;  %v171_v63 = vpop.f32.mrb[1].mxu0 }
 0x12c   :  { %v172_v0 = vadd.f32 %v171_v63, %v96_v60  ;;  %v173_v1 = vpop.f32.mrb[2].mxu0 }
 0x12d   :  { %v176_v2 = vmax.f32 %v170_v62, 0.0  ;;  %v174_v3 = vpop.f32.mrb[3].mxu0 }
 0x12e   :  { %v177_v4 = vmax.f32 %v172_v0, 0.0 }
 0x12f   :  { %v178_v6 = vpack.c.bf16 %v176_v2, %v176_v2 }
 0x130   :  { %v179_v5 = vpack.c.bf16 %v177_v4, %v177_v4 }
 0x132   :  { %416 = vmatprep.mubr.bf16.mxu1 %v179_v5 }
 0x133   :  { %417 = vmatmul.mubr.bf16.vlgmr.msra.gmra.mrb[0].mxu1 %v178_v6 }
 0x206   :  { %v418_v14 = vpop.f32.mrb[0].mxu1 }
 0x207   :  { %v419_v15 = vadd.f32 %v418_v14, %v217_v12  ;;  %v420_v16 = vpop.f32.mrb[1].mxu1 }
 0x208   :  { %v421_v17 = vadd.f32 %v420_v16, %v221_v13  ;;  %v422_v18 = vpop.f32.mrb[2].mxu1 }
 0x209   :  { %v425_v19 = vmax.f32 %v419_v15, 0.0  ;;  %v423_v20 = vpop.f32.mrb[3].mxu1 }
 0x20a   :  { %v426_v21 = vmax.f32 %v421_v17, 0.0 }
 0x20b   :  { %v427_v23 = vpack.c.bf16 %v425_v19, %v425_v19 }
 0x20c   :  { %v428_v22 = vpack.c.bf16 %v426_v21, %v426_v21 }
 0x20e   :  { %596 = vmatprep.mubr.bf16.mxu0 %v428_v22 }
 0x20f   :  { %597 = vmatmul.mubr.bf16.vlgmr.msra.gmra.mrb[4].mxu0 %v427_v23 }
 0x2e2   :  { %v704_v24 = vpop.f32.mrb[4].mxu0 }
 0x2e3   :  { %v705_v25 = vpop.f32.mrb[5].mxu0 }
 0x2e4   :  { %v706_v27 = vadd.f32 %v705_v25, %v704_v24  ;;  %v707_v28 = vpop.f32.mrb[6].mxu0 }
 0x2e5   :  { %v708_v29 = vpop.f32.mrb[7].mxu0 }
 0x2e6   :  { %v599_v30 = vadd.f32 %v706_v27, %v671_v26 }
 0x2e8   :  { %604 = vmax.xlane.f32.xlu0 %v599_v30 }
 0x375   :  { %v605_v31 = vpop.xlane.xlu0 %604 }
 0x376   :  { %v606_v32 = vsub.f32 %v599_v30, %v605_v31 }
 0x378   :  { %v607_v33 = vmul.f32 1.442695, %v606_v32 }
 0x37a   :  { %792 = vpow2.f32 %v607_v33 }
 0x384   :  { %v793_v34 = vpop.eup %792 }
 0x385   :  { %609 = vadd.xlane.f32.xlu0 %v793_v34 }
 0x412   :  { %v610_v35 = vpop.xlane.xlu0 %609 }
 0x413   :  { %794 = vrcp.f32 %v610_v35 }
 0x41d   :  { %v795_v36 = vpop.eup %794 }
 0x41e   :  { %v612_v37 = vmul.f32 %v795_v36, %v793_v34 }
 0x420   :  { %613 = vst [vmem:[#allocation10] sm:$0xff] %v612_v37 }
 0x421   :  { %895 = shalt.err (!%p892_p8)
}
 0x422   :  { %s896_s10 = scalar_lea.hbm %s1046_s7, 128 }
 0x423   :  { %p897_p9 = scmp.ne.s32.totalorder %s1046_s7, %s896_s10  ;;  %p900_p10 = scmp.lt.u32.totalorder %s896_s10, %s1046_s7 }
 0x425   :  { %p902_p11 = pnand %p900_p10, %p897_p9 }
 0x427   :  { %905 = shalt.err (!%p902_p11)
}
 0x428   :  { %623 = dma.vmem_to_hbm [thread:$0]  %s621_s30, 128, %s1046_s7, [#allocation4]  }
 0x429   :  { %912 = dma.done.wait [#allocation4], 128  }
 0x42a   :  { %913 = vsyncadd [#allocation4], 4294967168 }
 0x42b   :  { %627 = vsyncpa [#allocation3], 1 }
 0x42c   :  { %628 = vsyncpa [#allocation6], 1 }
 0x42d   :  { %629 = vsyncpa [#allocation9], 1 }
 0x42e   :  { %630 = vsyncpa [#allocation4], 1 }

</bundles_post_ra>
